<compile_context>
chip_gen: v7x
topology: tpu7x:2x2x1
jax: 0.10.0
libtpu: 0.0.40
codegen_flags: <defaults>
</compile_context>

<pallas_src>
import functools

import jax
import jax.numpy as jnp
from jax import lax
from jax.experimental import pallas as pl
from jax.experimental.pallas import tpu as pltpu

LANES = 128
SUBLANES = 8
_MAX_TILE_ROWS = 8192                       # 4 MiB f32 per input per block
_MIN_KERNEL_ELEMENTS = SUBLANES * LANES     # below one vreg tile: pure jnp wins


def _dice_partial_kernel(x_ref, t_ref, out_ref, inter_acc, sum_acc, *,
                         tile_rows, rows, steps_per_slice, need_mask):
    """Streaming partial-sum kernel.

    Grid = (num_slices ["parallel"], steps_per_slice ["arbitrary"]).
    x_ref, t_ref : VMEM (tile_rows, 128) tiles in native dtype (cast in-kernel).
    out_ref      : SMEM (1, 2) per-slice [intersection, sum(x)+sum(t)].
    inter_acc,
    sum_acc      : VMEM (8, 128) f32 vreg-sized running accumulators.
    """
    s = pl.program_id(0)
    i = pl.program_id(1)

    @pl.when(i == 0)
    def _init():
        inter_acc[...] = jnp.zeros_like(inter_acc)
        sum_acc[...] = jnp.zeros_like(sum_acc)

    x = x_ref[...].astype(jnp.float32)
    t = t_ref[...].astype(jnp.float32)

    def _accumulate(prod, both):
        # (tile_rows, 128) -> (8, 128): vreg-granule VALU tree adds only; the
        # cross-lane/sublane reduction is deferred to the epilogue.
        inter_acc[...] += jnp.sum(
            prod.reshape(tile_rows // SUBLANES, SUBLANES, LANES), axis=0)
        sum_acc[...] += jnp.sum(
            both.reshape(tile_rows // SUBLANES, SUBLANES, LANES), axis=0)

    if need_mask:
        blk = s * steps_per_slice + i          # global row-tile index
        row0 = blk * tile_rows                 # first global row of this tile

        @pl.when(row0 + tile_rows <= rows)     # steady state: no masking cost
        def _full_tile():
            _accumulate(x * t, x + t)

        @pl.when(row0 + tile_rows > rows)      # last / padding tile only
        def _ragged_tile():
            local = lax.broadcasted_iota(jnp.int32, (tile_rows, LANES), 0)
            valid = (row0 + local) < rows
            # Keep the select form: OOB rows may hold NaN garbage and a
            # multiplicative 0/1 mask would propagate it.
            _accumulate(jnp.where(valid, x * t, 0.0),
                        jnp.where(valid, x + t, 0.0))
    else:
        _accumulate(x * t, x + t)

    @pl.when(i == pl.num_programs(1) - 1)
    def _finalize():
        out_ref[0, 0] = jnp.sum(inter_acc[...])
        out_ref[0, 1] = jnp.sum(sum_acc[...])


def _vmem_capacity_bytes():
    try:
        info = pltpu.get_tpu_info()
        cap = int(getattr(info, "vmem_capacity_bytes", 128 << 20))
    except Exception:
        cap = 64 << 20
    return max(cap, 64 << 20)   # every supported generation has >= 64 MiB


def _dice_partial_sums(x2, t2, max_tile_rows=None):
    """x2, t2: (rows, 128), native dtype -> f32 (intersection, sum(x)+sum(t))."""
    rows = x2.shape[0]
    in_itemsize = jnp.dtype(x2.dtype).itemsize + jnp.dtype(t2.dtype).itemsize

    def _required_vmem(r):
        # double-buffered input tiles + ~2 f32 tile-sized element-wise temps
        return 2 * r * LANES * in_itemsize + 2 * r * LANES * 4

    vmem_cap = _vmem_capacity_bytes()
    budget = max(min(vmem_cap - (16 << 20), 48 << 20), 8 << 20)

    tile_rows = _MAX_TILE_ROWS if max_tile_rows is None else int(max_tile_rows)
    tile_rows = max(SUBLANES, (tile_rows // SUBLANES) * SUBLANES)
    while tile_rows > SUBLANES and _required_vmem(tile_rows) > budget:
        tile_rows //= 2
    tile_rows = max(SUBLANES, min(tile_rows, (rows // SUBLANES) * SUBLANES))

    total_blocks = pl.cdiv(rows, tile_rows)
    num_slices = 2 if total_blocks >= 2 else 1     # v7x: one slice per TensorCore
    steps_per_slice = pl.cdiv(total_blocks, num_slices)
    # The grid covers num_slices * steps_per_slice tiles; masking is needed iff
    # that overshoots the real row count (ragged last tile and/or padding step).
    need_mask = rows != tile_rows * num_slices * steps_per_slice
    pad_steps = num_slices * steps_per_slice != total_blocks

    def in_index_map(s, i):
        b = s * steps_per_slice + i
        if pad_steps:
            # Padding steps re-read the last real tile (their contribution is
            # fully masked in-kernel); never start a DMA window past the array.
            b = jnp.minimum(b, total_blocks - 1)
        return (b, 0)

    vmem_limit = int(min(vmem_cap - (8 << 20),
                         max(_required_vmem(tile_rows) + (16 << 20), 32 << 20)))

    kernel = functools.partial(
        _dice_partial_kernel,
        tile_rows=tile_rows, rows=rows,
        steps_per_slice=steps_per_slice, need_mask=need_mask)

    partials = pl.pallas_call(
        kernel,
        out_shape=jax.ShapeDtypeStruct((num_slices, 2), jnp.float32),
        grid_spec=pltpu.PrefetchScalarGridSpec(
            num_scalar_prefetch=0,
            grid=(num_slices, steps_per_slice),
            in_specs=[
                pl.BlockSpec((tile_rows, LANES), in_index_map),
                pl.BlockSpec((tile_rows, LANES), in_index_map),
            ],
            out_specs=pl.BlockSpec((1, 2), lambda s, i: (s, 0),
                                   memory_space=pltpu.SMEM),
            scratch_shapes=[
                pltpu.VMEM((SUBLANES, LANES), jnp.float32),
                pltpu.VMEM((SUBLANES, LANES), jnp.float32),
            ],
        ),
        compiler_params=pltpu.CompilerParams(
            dimension_semantics=("parallel", "arbitrary"),
            vmem_limit_bytes=vmem_limit,
        ),
    )(x2, t2)

    return jnp.sum(partials[:, 0]), jnp.sum(partials[:, 1])


def dice_loss(inputs, targets, smooth=1.0, max_tile_rows=None):
    """Pallas TPU implementation of DiceLoss.forward. Returns a scalar f32."""
    assert inputs.shape == targets.shape, "inputs/targets must match in shape"

    x = jnp.ravel(inputs)
    t = jnp.ravel(targets)
    n = x.shape[0]
    smooth = jnp.float32(smooth)

    if n < _MIN_KERNEL_ELEMENTS:
        # Launch + pipeline overhead dominates sub-vreg-tile problems.
        xf = x.astype(jnp.float32)
        tf = t.astype(jnp.float32)
        inter = jnp.sum(xf * tf)
        denom = jnp.sum(xf) + jnp.sum(tf)
        return 1.0 - (2.0 * inter + smooth) / (denom + smooth)

    rem = n % LANES
    n_main = n - rem
    rows = n_main // LANES
    # Zero-copy reshape when numel is lane-aligned (the common case).
    # TODO(synk): for numel % 128 != 0 the [:n_main] slice may still materialize
    # a copy; a fully copy-free ragged tail needs a manual-DMA (pl.ANY) path.
    x2 = x[:n_main].reshape(rows, LANES)
    t2 = t[:n_main].reshape(rows, LANES)

    inter, denom = _dice_partial_sums(x2, t2, max_tile_rows=max_tile_rows)

    if rem:
        # < 128 leftover elements: fold in with plain jnp instead of jnp.pad
        # (padding would rewrite both full arrays -> ~3x HBM traffic).
        xt = x[n_main:].astype(jnp.float32)
        tt = t[n_main:].astype(jnp.float32)
        inter = inter + jnp.sum(xt * tt)
        denom = denom + jnp.sum(xt) + jnp.sum(tt)

    dice = (2.0 * inter + smooth) / (denom + smooth)
    return 1.0 - dice


def _reference_dice_loss(inputs, targets, smooth=1.0):
    x = jnp.ravel(inputs).astype(jnp.float32)
    t = jnp.ravel(targets).astype(jnp.float32)
    inter = jnp.sum(x * t)
    dice = (2.0 * inter + smooth) / (jnp.sum(x) + jnp.sum(t) + smooth)
    return 1.0 - dice


if __name__ == "__main__":
    key = jax.random.PRNGKey(0)

    # (shape, dtype, max_tile_rows override) — small cases covering: single
    # block, lane-misaligned tail, multi-step grid + ragged last tile, bf16
    # streaming, and an odd block count (clamped padding step).
    cases = [
        ((2, 4, 16, 16), jnp.float32, None),
        ((3, 5, 17, 19), jnp.float32, None),
        ((2, 4, 60, 64), jnp.float32, 64),
        ((2, 4, 64, 64), jnp.bfloat16, 64),
        ((2, 4, 48, 64), jnp.float32, 64),
    ]

    for idx, (shape, dtype, max_rows) in enumerate(cases):
        key, k1, k2 = jax.random.split(key, 3)
        inputs = jax.nn.sigmoid(
            jax.random.normal(k1, shape, jnp.float32)).astype(dtype)
        targets = (jax.random.uniform(k2, shape) > 0.5).astype(dtype)

        loss = jax.block_until_ready(
            dice_loss(inputs, targets, smooth=1.0, max_tile_rows=max_rows))
        ref = _reference_dice_loss(inputs, targets, smooth=1.0)
        assert jnp.allclose(loss, ref, rtol=1e-5, atol=1e-5), (idx, loss, ref)

    print("KERNEL_OK")
</pallas_src>

<mosaic_0001>
module attributes {stable_mosaic.version = 11 : i64} {
  func.func @_dice_partial_kernel(%arg0: i32, %arg1: i32, %arg2: memref<16x128xf32, #tpu.memory_space<vmem>>, %arg3: memref<16x128xf32, #tpu.memory_space<vmem>>, %arg4: memref<1x2xf32, #tpu.memory_space<smem>>, %arg5: memref<8x128xf32, #tpu.memory_space<vmem>>, %arg6: memref<8x128xf32, #tpu.memory_space<vmem>>) attributes {dimension_semantics = [#tpu.dimension_semantics<parallel>, #tpu.dimension_semantics<arbitrary>], iteration_bounds = array<i64: 1, 1>, scalar_prefetch = 0 : i64, scratch_operands = 2 : i64, tpu.core_type = #tpu.core_type<tc>, window_params = [{transform_indices = @transform_0, window_bounds = array<i64: 16, 128>}, {transform_indices = @transform_1, window_bounds = array<i64: 16, 128>}, {transform_indices = @transform_2, window_bounds = array<i64: 1, 2>}]} {
    %c0_i32 = arith.constant 0 : i32
    %0 = arith.cmpi eq, %arg1, %c0_i32 : i32
    %1 = arith.extui %0 : i1 to i32
    %c0_i32_0 = arith.constant 0 : i32
    %2 = arith.cmpi ne, %1, %c0_i32_0 : i32
    scf.if %2 {
      %cst_15 = arith.constant 0.000000e+00 : f32
      %20 = vector.broadcast %cst_15 : f32 to vector<8x128xf32>
      %c0_16 = arith.constant 0 : index
      %c0_17 = arith.constant 0 : index
      %21 = vector.load %arg5[%c0_16, %c0_17] : memref<8x128xf32, #tpu.memory_space<vmem>>, vector<8x128xf32>
      tpu.vector_store %arg5[%c0_16, %c0_17], %20 {strides = array<i32>} : memref<8x128xf32, #tpu.memory_space<vmem>>, vector<8x128xf32>,
      %cst_18 = arith.constant 0.000000e+00 : f32
      %22 = vector.broadcast %cst_18 : f32 to vector<8x128xf32>
      %c0_19 = arith.constant 0 : index
      %c0_20 = arith.constant 0 : index
      %23 = vector.load %arg6[%c0_19, %c0_20] : memref<8x128xf32, #tpu.memory_space<vmem>>, vector<8x128xf32>
      tpu.vector_store %arg6[%c0_19, %c0_20], %22 {strides = array<i32>} : memref<8x128xf32, #tpu.memory_space<vmem>>, vector<8x128xf32>,
    } else {
    }
    %c0 = arith.constant 0 : index
    %c0_1 = arith.constant 0 : index
    %3 = vector.load %arg2[%c0, %c0_1] : memref<16x128xf32, #tpu.memory_space<vmem>>, vector<16x128xf32>
    %c0_2 = arith.constant 0 : index
    %c0_3 = arith.constant 0 : index
    %4 = vector.load %arg3[%c0_2, %c0_3] : memref<16x128xf32, #tpu.memory_space<vmem>>, vector<16x128xf32>
    %5 = arith.mulf %3, %4 : vector<16x128xf32>
    %6 = arith.addf %3, %4 : vector<16x128xf32>
    %c0_4 = arith.constant 0 : index
    %c0_5 = arith.constant 0 : index
    %7 = vector.load %arg5[%c0_4, %c0_5] : memref<8x128xf32, #tpu.memory_space<vmem>>, vector<8x128xf32>
    %8 = vector.shape_cast %5 : vector<16x128xf32> to vector<2x8x128xf32>
    %cst = arith.constant dense<0.000000e+00> : vector<8x128xf32>
    %9 = vector.multi_reduction <add>, %8, %cst [0] : vector<2x8x128xf32> to vector<8x128xf32>
    %10 = arith.addf %7, %9 : vector<8x128xf32>
    %c0_6 = arith.constant 0 : index
    %c0_7 = arith.constant 0 : index
    %11 = vector.load %arg5[%c0_6, %c0_7] : memref<8x128xf32, #tpu.memory_space<vmem>>, vector<8x128xf32>
    tpu.vector_store %arg5[%c0_6, %c0_7], %10 {strides = array<i32>} : memref<8x128xf32, #tpu.memory_space<vmem>>, vector<8x128xf32>,
    %c0_8 = arith.constant 0 : index
    %c0_9 = arith.constant 0 : index
    %12 = vector.load %arg6[%c0_8, %c0_9] : memref<8x128xf32, #tpu.memory_space<vmem>>, vector<8x128xf32>
    %13 = vector.shape_cast %6 : vector<16x128xf32> to vector<2x8x128xf32>
    %cst_10 = arith.constant dense<0.000000e+00> : vector<8x128xf32>
    %14 = vector.multi_reduction <add>, %13, %cst_10 [0] : vector<2x8x128xf32> to vector<8x128xf32>
    %15 = arith.addf %12, %14 : vector<8x128xf32>
    %c0_11 = arith.constant 0 : index
    %c0_12 = arith.constant 0 : index
    %16 = vector.load %arg6[%c0_11, %c0_12] : memref<8x128xf32, #tpu.memory_space<vmem>>, vector<8x128xf32>
    tpu.vector_store %arg6[%c0_11, %c0_12], %15 {strides = array<i32>} : memref<8x128xf32, #tpu.memory_space<vmem>>, vector<8x128xf32>,
    %c0_i32_13 = arith.constant 0 : i32
    %17 = arith.cmpi eq, %arg1, %c0_i32_13 : i32
    %18 = arith.extui %17 : i1 to i32
    %c0_i32_14 = arith.constant 0 : i32
    %19 = arith.cmpi ne, %18, %c0_i32_14 : i32
    scf.if %19 {
      %c0_15 = arith.constant 0 : index
      %c0_16 = arith.constant 0 : index
      %20 = vector.load %arg5[%c0_15, %c0_16] : memref<8x128xf32, #tpu.memory_space<vmem>>, vector<8x128xf32>
      %21 = vector.shape_cast %20 : vector<8x128xf32> to vector<1x8x128xf32>
      %cst_17 = arith.constant dense<0.000000e+00> : vector<1xf32>
      %22 = vector.multi_reduction <add>, %21, %cst_17 [1, 2] : vector<1x8x128xf32> to vector<1xf32>
      %23 = vector.shape_cast %22 : vector<1xf32> to vector<1x1x1xf32>
      %24 = vector.extract %23[0, 0, 0] : f32 from vector<1x1x1xf32>
      %c0_18 = arith.constant 0 : index
      %c0_19 = arith.constant 0 : index
      %25 = memref.load %arg4[%c0_18, %c0_19] : memref<1x2xf32, #tpu.memory_space<smem>>
      memref.store %24, %arg4[%c0_18, %c0_19] : memref<1x2xf32, #tpu.memory_space<smem>>
      %c0_20 = arith.constant 0 : index
      %c0_21 = arith.constant 0 : index
      %26 = vector.load %arg6[%c0_20, %c0_21] : memref<8x128xf32, #tpu.memory_space<vmem>>, vector<8x128xf32>
      %27 = vector.shape_cast %26 : vector<8x128xf32> to vector<1x8x128xf32>
      %cst_22 = arith.constant dense<0.000000e+00> : vector<1xf32>
      %28 = vector.multi_reduction <add>, %27, %cst_22 [1, 2] : vector<1x8x128xf32> to vector<1xf32>
      %29 = vector.shape_cast %28 : vector<1xf32> to vector<1x1x1xf32>
      %30 = vector.extract %29[0, 0, 0] : f32 from vector<1x1x1xf32>
      %c0_23 = arith.constant 0 : index
      %c1 = arith.constant 1 : index
      %31 = memref.load %arg4[%c0_23, %c1] : memref<1x2xf32, #tpu.memory_space<smem>>
      memref.store %30, %arg4[%c0_23, %c1] : memref<1x2xf32, #tpu.memory_space<smem>>
    } else {
    }
    return
  }
  func.func @transform_0(%arg0: i32, %arg1: i32) -> (i32, i32) {
    %c1_i32 = arith.constant 1 : i32
    %0 = arith.muli %arg0, %c1_i32 : i32
    %1 = arith.addi %0, %arg1 : i32
    %c0_i32 = arith.constant 0 : i32
    %c0_i32_0 = arith.constant 0 : i32
    return %1, %c0_i32 : i32, i32
  }
  func.func @transform_1(%arg0: i32, %arg1: i32) -> (i32, i32) {
    %c1_i32 = arith.constant 1 : i32
    %0 = arith.muli %arg0, %c1_i32 : i32
    %1 = arith.addi %0, %arg1 : i32
    %c0_i32 = arith.constant 0 : i32
    %c0_i32_0 = arith.constant 0 : i32
    return %1, %c0_i32 : i32, i32
  }
  func.func @transform_2(%arg0: i32, %arg1: i32) -> (i32, i32) {
    %c0_i32 = arith.constant 0 : i32
    %c0_i32_0 = arith.constant 0 : i32
    return %arg0, %c0_i32 : i32, i32
  }
}

</mosaic_0001>

<bundles_post_ra>
// kernel: tpu_custom_call.1
= control target key start
LH: loop header
LB: loop body
LE: loop exit
PB: predicated region body
PF: predicated region fallthrough
CT: control target
= control target key end

     0   :  { %7 = vsyncpa [#allocation5], 0  ;;  %s241_s0 = inlined_call_operand.hbm [shape: f32[16,128], index: 0, kind: input, shape index: {}]   ;;  %s242_s1 = inlined_call_operand.hbm [shape: f32[16,128], index: 1, kind: input, shape index: {}]   ;;  %s243_s2 = inlined_call_operand.hbm [shape: f32[1,2], index: 2, kind: output, shape index: {}]  }
   0x1   :  { %8 = vsyncpa [#allocation8], 0 }
   0x2   :  { %9 = vsyncpa [#allocation6], 0  ;;  %s185_s9 = smov [#allocation4]   ;;  %s125_s13 = scalar_lea.hbm %s241_s0, 256 }
   0x3   :  { %s19_s10 = sshll.u32 %s185_s9, 4  ;;  %p126_p0 = scmp.ne.s32.totalorder %s241_s0, %s125_s13  ;;  %s20_s10 = int_to_ptr.vmem [resolvable:$true] %s19_s10 }
   0x4   :  { %p129_p1 = scmp.lt.u32.totalorder %s125_s13, %s241_s0 }
   0x6   :  { %p131_p2 = pnand %p129_p1, %p126_p0 }
   0x8   :  { %134 = shalt.err (!%p131_p2)
}
   0x9   :  { %s135_s18 = scalar_lea.vmem %s20_s10, 256  ;;  %p140_p4 = scmp.lt.s32.totalorder %s20_s10, %s20_s10 }
   0xa   :  { %p136_p3 = scmp.ne.s32.totalorder %s20_s10, %s135_s18  ;;  %p141_p5 = scmp.lt.s32.totalorder %s135_s18, %s135_s18 }
   0xc   :  { %p142_p6 = por %p141_p5, %p140_p4 }
   0xe   :  { %p143_p7 = pnand %p142_p6, %p136_p3 }
  0x10   :  { %146 = shalt.err (!%p143_p7)
}
  0x11   :  { %s186_s19 = smov 128   ;;  %s187_s20 = smov 8  }
  0x12   :  { %25 = dma.hbm_to_vmem [thread:$0]  %s241_s0, 256, %s20_s10, [#allocation5], %s186_s19, %s186_s19, %s187_s20  }
  0x13   :  { %s188_s23 = smov [#allocation7]   ;;  %s147_s27 = scalar_lea.hbm %s242_s1, 256 }
  0x14   :  { %s35_s24 = sshll.u32 %s188_s23, 4  ;;  %p148_p8 = scmp.ne.s32.totalorder %s242_s1, %s147_s27  ;;  %s36_s24 = int_to_ptr.vmem [resolvable:$true] %s35_s24 }
  0x15   :  { %p151_p9 = scmp.lt.u32.totalorder %s147_s27, %s242_s1 }
  0x17   :  { %p153_p10 = pnand %p151_p9, %p148_p8 }
  0x19   :  { %156 = shalt.err (!%p153_p10)
}
  0x1a   :  { %s157_s4 = scalar_lea.vmem %s36_s24, 256  ;;  %p162_p12 = scmp.lt.s32.totalorder %s36_s24, %s36_s24 }
  0x1b   :  { %p158_p11 = scmp.ne.s32.totalorder %s36_s24, %s157_s4  ;;  %p163_p13 = scmp.lt.s32.totalorder %s157_s4, %s157_s4 }
  0x1d   :  { %p164_p0 = por %p163_p13, %p162_p12 }
  0x1f   :  { %p165_p1 = pnand %p164_p0, %p158_p11 }
  0x21   :  { %168 = shalt.err (!%p165_p1)
}
  0x22   :  { %41 = dma.hbm_to_vmem [thread:$0]  %s242_s1, 256, %s36_s24, [#allocation8], %s186_s19, %s186_s19, %s187_s20  }
  0x23   :  { %179 = dma.done.wait [#allocation5], 256  }
  0x24   :  { %180 = vsyncadd [#allocation5], 4294967040 }
  0x25   :  { %181 = dma.done.wait [#allocation8], 256  }
  0x26   :  { %182 = vsyncadd [#allocation8], 4294967040  ;;  %v58_v0 = vld [vmem:[#allocation4] sm:$0xff]  ;;  %v59_v1 = vld [vmem:[#allocation4 + $0x8] sm:$0xff]  ;;  %s169_s9 = scalar_lea.hbm %s243_s2, 16 }
  0x27   :  { %v60_v2 = vld [vmem:[#allocation7] sm:$0xff]  ;;  %v61_v3 = vld [vmem:[#allocation7 + $0x8] sm:$0xff]  ;;  %p170_p2 = scmp.ne.s32.totalorder %s243_s2, %s169_s9  ;;  %p173_p3 = scmp.lt.u32.totalorder %s169_s9, %s243_s2 }
  0x28   :  { %v62_v4 = vmul.f32 %v60_v2, %v58_v0  ;;  %v63_v5 = vmul.f32 %v61_v3, %v59_v1  ;;  %v64_v6 = vadd.f32 %v60_v2, %v58_v0  ;;  %v65_v7 = vadd.f32 %v61_v3, %v59_v1 }
  0x29   :  { %p175_p4 = pnand %p173_p3, %p170_p2 }
  0x2a   :  { %v67_v8 = vadd.f32 %v63_v5, %v62_v4  ;;  %v71_v9 = vadd.f32 %v65_v7, %v64_v6 }
  0x2c   :  { %78 = vadd.xlane.f32.xlu0 %v67_v8 }
  0x30   :  { %90 = vadd.xlane.f32.xlu0 %v71_v9 }
  0xb9   :  { %v79_v10 = vpop.xlane.xlu0 %78 }
  0xba   :  { %v80_v11 = vrot.slane %v79_v10, 4 }
  0xbc   :  { %v81_v12 = vadd.f32 %v80_v11, %v79_v10 }
  0xbd   :  { %v91_v13 = vpop.xlane.xlu0 %90 }
  0xbe   :  { %v82_v14 = vrot.slane %v81_v12, 2  ;;  %v92_v15 = vrot.slane %v91_v13, 4 }
  0xc0   :  { %v93_v16 = vadd.f32 %v92_v15, %v91_v13  ;;  %v83_v17 = vadd.f32 %v82_v14, %v81_v12 }
  0xc2   :  { %v94_v18 = vrot.slane %v93_v16, 2  ;;  %v84_v19 = vrot.slane %v83_v17, 1 }
  0xc4   :  { %v95_v20 = vadd.f32 %v94_v18, %v93_v16  ;;  %v85_v21 = vadd.f32 %v84_v19, %v83_v17 }
  0xc6   :  { %116 = vpush %v85_v21  ;;  %v96_v22 = vrot.slane %v95_v20, 1 }
  0xc8   :  { %v97_v23 = vadd.f32 %v96_v22, %v95_v20 }
  0xca   :  { %118 = vpush %v97_v23 }
  0xf7   :  { %s117_s1 = spop %116 }
  0xf8   :  { %88 = sst [smem:[#allocation9]] %s117_s1 }
  0xfb   :  { %s119_s6 = spop %118 }
  0xfc   :  { %100 = sst [smem:[#allocation9 + $0x1]] %s119_s6 }
  0xfd   :  { %178 = shalt.err (!%p175_p4)
}
  0xfe   :  { %s189_s14 = smov [#allocation9]  }
  0xff   :  { %108 = dma.smem_to_hbm %s189_s14, 16, %s243_s2, [#allocation6]  }
 0x100   :  { %183 = dma.done.wait [#allocation6], 16  }
 0x101   :  { %184 = vsyncadd [#allocation6], 4294967280 }
 0x102   :  { %112 = sfence }
 0x103   :  { %113 = vsyncpa [#allocation5], 1 }
 0x104   :  { %114 = vsyncpa [#allocation8], 1 }
 0x105   :  { %115 = vsyncpa [#allocation6], 1 }

</bundles_post_ra>
